<compile_context>
chip_gen: v7x
topology: tpu7x:2x2x1
jax: 0.10.0
libtpu: 0.0.40
codegen_flags: <defaults>
</compile_context>

<pallas_src>
import jax
import jax.numpy as jnp
from jax.experimental import pallas as pl
from jax.experimental.pallas import tpu as pltpu


def _make_convt_kernel(KH, KW, WO):
    def convt_kernel(x_ref, w_ref, b_ref, o_ref):
        # x_ref : (1, Cin_p, LP)  one batch element, spatial flattened on lanes
        #                         with common row width WO (W-pad / tail are zero)
        # w_ref : (Cout, KH*KW*Cin_p)  rows ordered (kh, kw, ci)
        # b_ref : (Cout, 1)
        # o_ref : (1, Cout, LP)  lane-dense output tile
        x = x_ref[0]                                     # (Cin_p, LP)
        cols = []
        for kh in range(KH):                             # static unroll, KH*KW small
            for kw in range(KW):
                s = kh * WO + kw                         # scatter offset of this tap
                # wrap-around brings only zeros because LP >= H*WO + s_max
                cols.append(x if s == 0 else pltpu.roll(x, shift=s, axis=1))
        xcol = jnp.concatenate(cols, axis=0)             # (KH*KW*Cin_p, LP) im2col
        out = jnp.dot(w_ref[...], xcol,                  # single MXU matmul
                      preferred_element_type=jnp.float32)
        out = out + b_ref[...]                           # bias, (Cout,1) bcast over lanes
        # activation is Identity for the module defaults
        # TODO(synk): optional batchnorm ('pre'/'post'), Dropout2d and non-identity
        # activations of the module are off by default and not implemented here.
        o_ref[0] = out.astype(o_ref.dtype)
    return convt_kernel


def conv_transpose2d_pallas(x_nchw, weight, bias):
    """ConvTranspose2d forward (stride=1, padding=0, dilation=1).

    x_nchw : (N, Cin, H, W)        -- PyTorch layout
    weight : (Cin, Cout, KH, KW)   -- PyTorch ConvTranspose2d weight layout
    bias   : (Cout,)
    returns: (N, Cout, H+KH-1, W+KW-1)
    """
    N, Cin, H, W = x_nchw.shape
    _, Cout, KH, KW = weight.shape
    HO, WO = H + KH - 1, W + KW - 1
    L = HO * WO
    # lane-padded flattened spatial length; the extra KW-1 guarantees every
    # roll's wrapped tail lands in guaranteed-zero padding.
    LP = ((L + KW - 1 + 127) // 128) * 128
    Cin_p = ((Cin + 7) // 8) * 8                         # sublane-aligned channels

    # ---- cheap glue: trailing zero-pads only, no data transposes on x ----
    # pad W -> WO so input and output rows share a common flattened row width,
    # pad Cin -> Cin_p for sublane alignment, flatten spatial onto the lane
    # axis and pad the tail to LP full lanes.
    x_rows = jnp.pad(x_nchw, ((0, 0), (0, Cin_p - Cin), (0, 0), (0, KW - 1)))
    x_flat = x_rows.reshape(N, Cin_p, H * WO)
    x_flat = jnp.pad(x_flat, ((0, 0), (0, 0), (0, LP - H * WO)))      # (N,Cin_p,LP)

    # (Cin,Cout,KH,KW) -> (Cout, KH*KW*Cin_p); row order (kh,kw,ci) matches im2col
    w_pad = jnp.pad(weight, ((0, Cin_p - Cin), (0, 0), (0, 0), (0, 0)))
    w_mat = jnp.transpose(w_pad, (1, 2, 3, 0)).reshape(Cout, KH * KW * Cin_p)
    b_col = bias.reshape(Cout, 1)

    kernel = _make_convt_kernel(KH, KW, WO)

    flops = 2 * N * Cout * (KH * KW * Cin_p) * LP
    bytes_accessed = 4 * (x_flat.size + w_mat.size + b_col.size + N * Cout * LP)

    out_flat = pl.pallas_call(
        kernel,
        out_shape=jax.ShapeDtypeStruct((N, Cout, LP), x_nchw.dtype),
        grid_spec=pltpu.PrefetchScalarGridSpec(
            num_scalar_prefetch=0,
            grid=(N,),
            in_specs=[
                pl.BlockSpec((1, Cin_p, LP), lambda n: (n, 0, 0)),
                pl.BlockSpec((Cout, KH * KW * Cin_p), lambda n: (0, 0)),
                pl.BlockSpec((Cout, 1), lambda n: (0, 0)),
            ],
            out_specs=pl.BlockSpec((1, Cout, LP), lambda n: (n, 0, 0)),
        ),
        compiler_params=pltpu.CompilerParams(
            dimension_semantics=("parallel",)),
        cost_estimate=pl.CostEstimate(
            flops=flops, transcendentals=0, bytes_accessed=bytes_accessed),
    )(x_flat, w_mat, b_col)

    # drop lane padding and un-flatten spatial (contiguous reshape, no transpose)
    return out_flat[:, :, :L].reshape(N, Cout, HO, WO)


def conv_transpose2d_ref(x_nchw, weight, bias):
    """Pure-JAX reference straight from the ConvTranspose2d scatter definition."""
    N, Cin, H, W = x_nchw.shape
    _, Cout, KH, KW = weight.shape
    out = jnp.zeros((N, Cout, H + KH - 1, W + KW - 1), jnp.float32)
    for kh in range(KH):
        for kw in range(KW):
            contrib = jnp.einsum('nchw,co->nohw', x_nchw, weight[:, :, kh, kw])
            out = out.at[:, :, kh:kh + H, kw:kw + W].add(contrib)
    return (out + bias[None, :, None, None]).astype(x_nchw.dtype)


if __name__ == "__main__":
    # module config: in_channels=4, out_channels=8, kernel_size=3 (defaults otherwise)
    IN_CH, OUT_CH, K = 4, 8, 3
    N, H, W = 2, 16, 16

    key = jax.random.PRNGKey(0)
    kx, kw, kb = jax.random.split(key, 3)

    # deterministic parameter init (PyTorch-style uniform +-1/sqrt(fan))
    fan = IN_CH * K * K
    bound = 1.0 / (fan ** 0.5)
    weight = jax.random.uniform(kw, (IN_CH, OUT_CH, K, K), jnp.float32,
                                -bound, bound)
    bias = jax.random.uniform(kb, (OUT_CH,), jnp.float32, -bound, bound)
    x = jax.random.normal(kx, (N, IN_CH, H, W), jnp.float32)

    out = jax.block_until_ready(conv_transpose2d_pallas(x, weight, bias))
    ref = conv_transpose2d_ref(x, weight, bias)

    assert out.shape == (N, OUT_CH, H + K - 1, W + K - 1), out.shape
    assert jnp.allclose(out, ref, atol=1e-4, rtol=1e-4), \
        float(jnp.max(jnp.abs(out - ref)))

    print("KERNEL_OK")
</pallas_src>

<mosaic_0001>
module attributes {stable_mosaic.version = 11 : i64} {
  func.func @convt_kernel(%arg0: i32, %arg1: memref<1x8x384xf32, #tpu.memory_space<vmem>>, %arg2: memref<8x72xf32, #tpu.memory_space<vmem>>, %arg3: memref<8x1xf32, #tpu.memory_space<vmem>>, %arg4: memref<1x8x384xf32, #tpu.memory_space<vmem>>) attributes {dimension_semantics = [#tpu.dimension_semantics<parallel>], iteration_bounds = array<i64: 2>, scalar_prefetch = 0 : i64, scratch_operands = 0 : i64, tpu.core_type = #tpu.core_type<tc>, window_params = [{transform_indices = @transform_0, window_bounds = array<i64: 1, 8, 384>}, {pipeline_mode = #tpu.pipeline_mode<synchronous>, transform_indices = @transform_1, window_bounds = array<i64: 8, 72>}, {pipeline_mode = #tpu.pipeline_mode<synchronous>, transform_indices = @transform_2, window_bounds = array<i64: 8, 1>}, {transform_indices = @transform_3, window_bounds = array<i64: 1, 8, 384>}]} {
    %c0 = arith.constant 0 : index
    %c0_0 = arith.constant 0 : index
    %c0_1 = arith.constant 0 : index
    %0 = vector.load %arg1[%c0, %c0_0, %c0_1] : memref<1x8x384xf32, #tpu.memory_space<vmem>>, vector<1x8x384xf32>
    %1 = vector.shape_cast %0 : vector<1x8x384xf32> to vector<8x384xf32>
    %c1_i32 = arith.constant 1 : i32
    %2 = tpu.dynamic_rotate %1 by %c1_i32 dim 1 : vector<8x384xf32>, i32 -> vector<8x384xf32>
    %c2_i32 = arith.constant 2 : i32
    %3 = tpu.dynamic_rotate %1 by %c2_i32 dim 1 : vector<8x384xf32>, i32 -> vector<8x384xf32>
    %c18_i32 = arith.constant 18 : i32
    %4 = tpu.dynamic_rotate %1 by %c18_i32 dim 1 : vector<8x384xf32>, i32 -> vector<8x384xf32>
    %c19_i32 = arith.constant 19 : i32
    %5 = tpu.dynamic_rotate %1 by %c19_i32 dim 1 : vector<8x384xf32>, i32 -> vector<8x384xf32>
    %c20_i32 = arith.constant 20 : i32
    %6 = tpu.dynamic_rotate %1 by %c20_i32 dim 1 : vector<8x384xf32>, i32 -> vector<8x384xf32>
    %c36_i32 = arith.constant 36 : i32
    %7 = tpu.dynamic_rotate %1 by %c36_i32 dim 1 : vector<8x384xf32>, i32 -> vector<8x384xf32>
    %c37_i32 = arith.constant 37 : i32
    %8 = tpu.dynamic_rotate %1 by %c37_i32 dim 1 : vector<8x384xf32>, i32 -> vector<8x384xf32>
    %c38_i32 = arith.constant 38 : i32
    %9 = tpu.dynamic_rotate %1 by %c38_i32 dim 1 : vector<8x384xf32>, i32 -> vector<8x384xf32>
    %10 = tpu.concatenate %1, %2, %3, %4, %5, %6, %7, %8, %9 in 0 : vector<8x384xf32>, vector<8x384xf32>, vector<8x384xf32>, vector<8x384xf32>, vector<8x384xf32>, vector<8x384xf32>, vector<8x384xf32>, vector<8x384xf32>, vector<8x384xf32> -> vector<72x384xf32>
    %c0_2 = arith.constant 0 : index
    %c0_3 = arith.constant 0 : index
    %11 = vector.load %arg2[%c0_2, %c0_3] : memref<8x72xf32, #tpu.memory_space<vmem>>, vector<8x72xf32>
    %cst = arith.constant dense<0.000000e+00> : vector<8x384xf32>
    %12 = tpu.matmul %11, %10, %cst {dimension_numbers = #tpu.dot_dimension_numbers<[1], [0], [0], [1], [0, 0, 1, 1], [], []>} : vector<8x72xf32>, vector<72x384xf32>, vector<8x384xf32> -> vector<8x384xf32>
    %c0_4 = arith.constant 0 : index
    %c0_5 = arith.constant 0 : index
    %13 = vector.load %arg3[%c0_4, %c0_5] : memref<8x1xf32, #tpu.memory_space<vmem>>, vector<8x1xf32>
    %14 = vector.broadcast %13 : vector<8x1xf32> to vector<8x384xf32>
    %15 = arith.addf %12, %14 : vector<8x384xf32>
    %c0_6 = arith.constant 0 : index
    %c0_7 = arith.constant 0 : index
    %c0_8 = arith.constant 0 : index
    %16 = vector.load %arg4[%c0_6, %c0_7, %c0_8] : memref<1x8x384xf32, #tpu.memory_space<vmem>>, vector<1x8x384xf32>
    %17 = vector.shape_cast %16 : vector<1x8x384xf32> to vector<8x384xf32>
    %18 = vector.shape_cast %15 : vector<8x384xf32> to vector<1x8x384xf32>
    tpu.vector_store %arg4[%c0_6, %c0_7, %c0_8], %18 {strides = array<i32>} : memref<1x8x384xf32, #tpu.memory_space<vmem>>, vector<1x8x384xf32>,
    return
  }
  func.func @transform_0(%arg0: i32) -> (i32, i32, i32) {
    %c0_i32 = arith.constant 0 : i32
    %c0_i32_0 = arith.constant 0 : i32
    %c0_i32_1 = arith.constant 0 : i32
    return %arg0, %c0_i32, %c0_i32_0 : i32, i32, i32
  }
  func.func @transform_1(%arg0: i32) -> (i32, i32) {
    %c0_i32 = arith.constant 0 : i32
    %c0_i32_0 = arith.constant 0 : i32
    %c0_i32_1 = arith.constant 0 : i32
    return %c0_i32, %c0_i32_0 : i32, i32
  }
  func.func @transform_2(%arg0: i32) -> (i32, i32) {
    %c0_i32 = arith.constant 0 : i32
    %c0_i32_0 = arith.constant 0 : i32
    %c0_i32_1 = arith.constant 0 : i32
    return %c0_i32, %c0_i32_0 : i32, i32
  }
  func.func @transform_3(%arg0: i32) -> (i32, i32, i32) {
    %c0_i32 = arith.constant 0 : i32
    %c0_i32_0 = arith.constant 0 : i32
    %c0_i32_1 = arith.constant 0 : i32
    return %arg0, %c0_i32, %c0_i32_0 : i32, i32, i32
  }
}

</mosaic_0001>

<bundles_post_ra>
// kernel: tpu_custom_call.1
= control target key start
LH: loop header
LB: loop body
LE: loop exit
PB: predicated region body
PF: predicated region fallthrough
CT: control target
= control target key end

     0   :  { %8 = vsyncpa [#allocation3], 0  ;;  %s1011_s0 = inlined_call_operand.hbm [shape: f32[2,8,384], index: 0, kind: input, shape index: {}]   ;;  %s1012_s1 = inlined_call_operand.vmem [shape: f32[8,72], index: 1, kind: input, shape index: {}]   ;;  %s1013_s2 = inlined_call_operand.vmem [shape: f32[8,1], index: 2, kind: input, shape index: {}]   ;;  %s1014_s3 = inlined_call_operand.hbm [shape: f32[2,8,384], index: 3, kind: output, shape index: {}]  }
   0x1   :  { %10 = vsyncpa [#allocation3 + $0x1], 0 }
   0x2   :  { %11 = vsyncpa [#allocation4], 0 }
   0x3   :  { %13 = vsyncpa [#allocation4 + $0x1], 0  ;;  %s812_s12 = smov 0   ;;  %s814_s13 = smov 0  }
   0x4   :  { %s816_s14 = smov 0   ;;  %s818_s15 = smov 0  }
   0x5 LB: > { %s833_s16 = sadd.s32 4294967295, %s776_s15   ;;  %s512_s17 = sadd.s32 4294967294, %s776_s15   ;;  %s776_s15 = sphi %s818_s15, %s1028_s15   ;;  %s772_s14 = sphi %s816_s14, %s1027_s14   ;;  %s768_s13 = sphi %s814_s13, %s1026_s13   ;;  %s764_s12 = sphi %s812_s12, %s1025_s12  }
   0x6   : > { %s837_s18 = sadd.s32 1, %s776_s15   ;;  %s26_s19 = sadd.s32 1, %s772_s14 }
   0x7   : > { %s23_s20 = ssub.s32 %s776_s15, %s837_s18  ;;  %p33_p0 = scmp.ne.s32.totalorder %s772_s14, %s768_s13 }
   0x8   : > { %p24_p1 = scmp.eq.s32.totalorder %s23_s20, 0  ;;  %p34_p2 = scmp.eq.s32.totalorder %s776_s15, 0 }
   0x9   : > { %p39_p3 = scmp.ne.s32.totalorder %s768_s13, %s764_s12  ;;  %p40_p4 = scmp.eq.s32.totalorder %s833_s16, 0 }
   0xa   : > { %s849_s21 = scalar_select %p24_p1, %s772_s14, %s26_s19  }
   0xb   : > { %p35_p5 = por %p34_p2, %p33_p0  ;;  %p851_p6 = por %p40_p4, %p39_p3 }
   0xc   : > { %p105_p7 = scmp.eq.s32.totalorder %s833_s16, 1  ;;  %p111_p8 = scmp.eq.s32.totalorder %s512_s17, 1 }
   0xd   : > { %p597_p10 = scmp.lt.s32.totalorder %s776_s15, 2  ;;  %s137_s25 = sand.u32 1, %s772_s14  }
   0xe   : > { %p858_p11 = por %p105_p7, %p33_p0  ;;  %p862_p12 = por %p111_p8, %p39_p3 }
   0xf   : > { %s582_s26 = smul.u32 384, %s776_s15  ;;  %p873_p13 = pnand %p597_p10, %p35_p5 }
  0x10   : > { %s1017_s23 = scalar_select %p858_p11, 1, 0 }
  0x11   : > { %s1018_s24 = scalar_select %p862_p12, 1, 0 }
  0x12   : > { %s581_s27 = smul.u32 24, %s137_s25  ;;  %s871_s30 = scalar_lea.hbm %s1011_s0, %s582_s26 }
  0x13   : > { %s138_s7 = scalar_lea.sflag [#allocation3], %s137_s25  ;;  %s680_s8 = scalar_lea.hbm %s871_s30, 384 }
  0x14   : > { %s141_s5 = scalar_lea.vmem [#allocation2], %s581_s27  ;;  %p681_p2 = scmp.ne.s32.totalorder %s871_s30, %s680_s8 }
  0x15   : > { %s149_s6 = sshll.u32 %s141_s5, 4  ;;  %p682_p3 = pneg %p873_p13  ;;  %s878_s6 = int_to_ptr.vmem [resolvable:$true] %s149_s6 }
  0x16   : > { %s685_s11 = scalar_lea.hbm %s1011_s0, 768  ;;  %p686_p7 = scmp.lt.u32.totalorder %s871_s30, %s1011_s0 }
  0x17   : > { %p683_p4 = pnand %p682_p3, %p681_p2  ;;  %p687_p8 = scmp.lt.u32.totalorder %s685_s11, %s680_s8 }
  0x18   : > { %p689_p9 = scmp.lt.u32.totalorder %s680_s8, %s871_s30 }
  0x19   : > { %p684_p5 = pneg %p683_p4  ;;  %p688_p10 = por %p687_p8, %p686_p7 }
  0x1b   : > { %p690_p0 = por %p689_p9, %p688_p10 }
  0x1d   : > { %p691_p1 = pnand %p690_p0, %p684_p5 }
  0x1f   : > { %694 = shalt.err (!%p691_p1)
}
  0x20   : > { %s695_s20 = scalar_lea.vmem %s878_s6, 384  ;;  %s778_s25 = smov [#allocation2]  }
  0x21   : > { %p696_p2 = scmp.ne.s32.totalorder %s878_s6, %s695_s20  ;;  %s700_s26 = sshll.u32 %s778_s25, 4  ;;  %s701_s26 = int_to_ptr.vmem [resolvable:$false] %s700_s26 }
  0x22   : > { %s702_s27 = scalar_lea.vmem %s701_s26, 768  ;;  %p703_p11 = scmp.lt.s32.totalorder %s878_s6, %s701_s26 }
  0x23   : > { %p698_p4 = pnand %p696_p2, %p682_p3  ;;  %p704_p7 = scmp.lt.s32.totalorder %s702_s27, %s695_s20 }
  0x25   : > { %p699_p12 = pneg %p698_p4  ;;  %p705_p8 = por %p704_p7, %p703_p11 }
  0x27   : > { %p706_p9 = pnand %p705_p8, %p699_p12 }
  0x29   : > { %709 = shalt.err (!%p706_p9)
}
  0x2a   : > { %592 = dma.hbm_to_vmem [thread:$0]  (!%p873_p13), %s871_s30, 384, %s878_s6, %s138_s7  }
  0x2b   : > { %p1020_p0 = scmp.lt.s32.totalorder %s776_s15, 3  ;;  %p1021_p1 = scmp.ge.s32.totalorder %s776_s15, 1 }
  0x2d   : > { %p155_p3 = pnand %p1021_p1, %p1020_p0 }
  0x2e   : > { %s911_s28 = sand.u32 (!%p155_p3), 1, %s768_s13  }
  0x2f   : > { %158 = sbr.rel (%p155_p3) target bundleno = 436 (0x1b4), region = 32  ;;  %s161_s5 = scalar_lea.sflag (!%p155_p3), [#allocation3], %s911_s28 }
  0x30   : > { %s583_s29 = smul.u32 (!%p155_p3), 24, %s911_s28 }
  0x32   : > { %s164_s4 = scalar_lea.vmem (!%p155_p3), [#allocation2], %s583_s29 }
  0x36   : > { %755 = dma.done.wait (%p851_p6), %s161_s5, 384  }
  0x37   : > { %757 = vsyncadd (%p851_p6), %s161_s5, 4294966912  ;;  %v779_v0 = vmov 0.0|0.0   ;;  %v922_v1 = vld [vmem:[%s164_s4] sm:$0xff]  ;;  %v188_v2 = vld [vmem:[%s164_s4 + $0x8] sm:$0xff]  ;;  %s780_s30 = smov 2   ;;  %s781_s6 = smov 1   ;;  %v196_v8 = vlaneseq }
  0x38   : > { %569 = vmatprep.subr.bf16.mxu1 %v779_v0  ;;  %v648_v3 = vpack.i.bf16 %v188_v2, %v922_v1  ;;  %v189_v4 = vld [vmem:[%s164_s4 + $0x10] sm:$0xff]  ;;  %s782_s7 = smov 18   ;;  %s783_s22 = smov 20   ;;  %v785_v5 = vmov 0.0   ;;  %vm788_vm0 = vmmov 0   ;;  %v789_v6 = vmov 0  }
  0x39   : > { %s784_s8 = smov 19   ;;  %347 = vmatprep.mubr.f32.mxu0 %v785_v5  ;;  %s786_s9 = smov 37   ;;  %550 = vmatprep.mubr.msk.f32.mxu1 %vm788_vm0, %v785_v5  ;;  %v273_v7 = vld [vmem:[%s1013_s2] sm:$0xff]  ;;  %v931_v9 = vand.u32 127, %v196_v8  ;;  %vm279_vm9 = vcmask 588800  }
  0x3a   : > { %649 = vrot.lane.b32.xlu1 %v648_v3, %s780_s30  ;;  %644 = vrot.lane.b32.xlu0 %v648_v3, %s781_s6  ;;  %s787_s10 = smov 36   ;;  %s790_s11 = smov 38  }
  0x3b   : > { %678 = vset.pattern.permute.xlu1 %v789_v6  ;;  %679 = vset.pattern.permute.xlu0 %v789_v6  ;;  %vm198_vm1 = vcmp.lt.s32.totalorder %v931_v9, 1  ;;  %vm218_vm2 = vcmp.lt.s32.totalorder %v931_v9, 18  ;;  %vm208_vm3 = vcmp.lt.s32.totalorder %v931_v9, 2  ;;  %vm238_vm4 = vcmp.lt.s32.totalorder %v931_v9, 20  ;;  %s584_s26 = smul.u32 384, %s833_s16  ;;  %s186_s27 = scalar_lea.vmem [#allocation5], %s583_s29 }
  0x3c   : > { %vm228_vm5 = vcmp.lt.s32.totalorder %v931_v9, 19  ;;  %vm258_vm6 = vcmp.lt.s32.totalorder %v931_v9, 37  ;;  %vm248_vm7 = vcmp.lt.s32.totalorder %v931_v9, 36  ;;  %vm268_vm8 = vcmp.lt.s32.totalorder %v931_v9, 38  ;;  %s442_s5 = sshll.u32 %s186_s27, 4  ;;  %s428_s16 = scalar_lea.sflag [#allocation4], %s911_s28  ;;  %s969_s5 = int_to_ptr.vmem [resolvable:$true] %s442_s5 }
  0x3d   : > { %s710_s29 = scalar_lea.vmem %s969_s5, 384  ;;  %p1022_p11 = scmp.ne.s32.totalorder %s1017_s23, 0 }
  0x3e   : > { %654 = vrot.lane.b32.xlu1 %v648_v3, %s782_s7  ;;  %194 = vrot.lane.b32.xlu0 %v189_v4, %s781_s6  ;;  %s967_s6 = scalar_lea.hbm %s1014_s3, %s584_s26  ;;  %p711_p6 = scmp.ne.s32.totalorder %s969_s5, %s710_s29 }
  0x40   : > { %p712_p12 = pnand %p711_p6, %p1022_p11 }
  0x42   : > { %216 = vrot.lane.b32.xlu1 %v189_v4, %s782_s7  ;;  %206 = vrot.lane.b32.xlu0 %v189_v4, %s780_s30  ;;  %p713_p13 = pneg %p712_p12  ;;  %s791_s7 = smov [#allocation5]  }
  0x46   : > { %664 = vrot.lane.b32.xlu1 %v648_v3, %s783_s22  ;;  %659 = vrot.lane.b32.xlu0 %v648_v3, %s784_s8 }
  0x4a   : > { %236 = vrot.lane.b32.xlu1 %v189_v4, %s783_s22  ;;  %226 = vrot.lane.b32.xlu0 %v189_v4, %s784_s8  ;;  %s714_s22 = sshll.u32 %s791_s7, 4  ;;  %s715_s22 = int_to_ptr.vmem [resolvable:$false] %s714_s22 }
  0x4b   : > { %s716_s8 = scalar_lea.vmem %s715_s22, 768  ;;  %p717_p5 = scmp.lt.s32.totalorder %s969_s5, %s715_s22 }
  0x4c   : > { %p718_p10 = scmp.lt.s32.totalorder %s716_s8, %s710_s29 }
  0x4e   : > { %674 = vrot.lane.b32.xlu1 %v648_v3, %s786_s9  ;;  %669 = vrot.lane.b32.xlu0 %v648_v3, %s787_s10  ;;  %p719_p2 = por %p718_p10, %p717_p5 }
  0x50   : > { %p720_p4 = pnand %p719_p2, %p713_p13 }
  0x52   : > { %256 = vrot.lane.b32.xlu1 %v189_v4, %s786_s9  ;;  %246 = vrot.lane.b32.xlu0 %v189_v4, %s787_s10 }
  0x56   : > { %264 = vrot.lane.b32.xlu1 %v188_v2, %s790_s11  ;;  %262 = vrot.lane.b32.xlu0 %v922_v1, %s790_s11 }
  0x5a   : > { %266 = vrot.lane.b32.xlu0 %v189_v4, %s790_s11  ;;  %276 = vperm.xlu1 %678, %v273_v7  }
  0xac   : > { %v650_v10 = vpop.permute.xlu1 %649  ;;  %v645_v11 = vpop.permute.xlu0 %644 }
  0xad   : > { %v647_v12 = vunpack.i.h.bf16 %v645_v11  ;;  %v646_v13 = vunpack.i.l.bf16 %v645_v11  ;;  %v652_v14 = vunpack.i.h.bf16 %v650_v10  ;;  %v651_v15 = vunpack.i.l.bf16 %v650_v10 }
  0xaf   : > { %v200_v16 = vsel %vm198_vm1, %v646_v13, %v647_v12  ;;  %v210_v26 = vsel %vm208_vm3, %v651_v15, %v652_v14 }
  0xb0   : > { %v655_v17 = vpop.permute.xlu1 %654  ;;  %v195_v18 = vpop.permute.xlu0 %194  ;;  %v553_v19 = vpack.c.bf16 %v200_v16, %v188_v2 }
  0xb1   : > { %v657_v20 = vunpack.i.h.bf16 %v655_v17  ;;  %v656_v21 = vunpack.i.l.bf16 %v655_v17  ;;  %v199_v22 = vsel %vm198_vm1, %v647_v12, %v195_v18  ;;  %v201_v23 = vsel %vm198_vm1, %v195_v18, %v646_v13  ;;  %v272_v13 = vld [vmem:[%s1012_s1] sm:$0xff] }
  0xb2   : > { %554 = vmatprep.subr.bf16.mxu0 %v553_v19  ;;  %v555_v24 = vpack.c.bf16 %v201_v23, %v922_v1  ;;  %v570_v25 = vpack.c.bf16 %v199_v22, %v189_v4 }
  0xb3   : > { %v220_v27 = vsel %vm218_vm2, %v656_v21, %v657_v20 }
  0xb4   : > { %v217_v28 = vpop.permute.xlu1 %216  ;;  %v207_v29 = vpop.permute.xlu0 %206  ;;  %556 = vmatpush1.bf16.msra.mxu0 %v555_v24  ;;  %571 = vmatpush3.bf16.msra.mxu1 %v570_v25  ;;  %v557_v30 = vpack.c.bf16 %v220_v27, %v210_v26 }
  0xb5   : > { %v219_v31 = vsel %vm218_vm2, %v657_v20, %v217_v28  ;;  %v221_v32 = vsel %vm218_vm2, %v217_v28, %v656_v21  ;;  %v209_v33 = vsel %vm208_vm3, %v652_v14, %v207_v29  ;;  %v211_v34 = vsel %vm208_vm3, %v207_v29, %v651_v15  ;;  %572 = vmatprep.subr.bf16.mxu1 %v779_v0 }
  0xb6   : > { %v559_v35 = vpack.c.bf16 %v221_v32, %v211_v34  ;;  %v573_v36 = vpack.c.bf16 %v219_v31, %v209_v33  ;;  %558 = vmatprep.subr.bf16.mxu0 %v557_v30 }
  0xb8   : > { %v665_v37 = vpop.permute.xlu1 %664  ;;  %v660_v38 = vpop.permute.xlu0 %659  ;;  %560 = vmatpush1.bf16.msra.mxu0 %v559_v35  ;;  %574 = vmatpush3.bf16.msra.mxu1 %v573_v36 }
  0xb9   : > { %v667_v39 = vunpack.i.h.bf16 %v665_v37  ;;  %v666_v40 = vunpack.i.l.bf16 %v665_v37  ;;  %v662_v41 = vunpack.i.h.bf16 %v660_v38  ;;  %v661_v42 = vunpack.i.l.bf16 %v660_v38  ;;  %575 = vmatprep.subr.bf16.mxu1 %v779_v0 }
  0xbb   : > { %v230_v43 = vsel %vm228_vm5, %v661_v42, %v662_v41  ;;  %v240_v44 = vsel %vm238_vm4, %v666_v40, %v667_v39 }
  0xbc   : > { %v237_v45 = vpop.permute.xlu1 %236  ;;  %v227_v46 = vpop.permute.xlu0 %226  ;;  %v561_v47 = vpack.c.bf16 %v240_v44, %v230_v43 }
  0xbd   : > { %v239_v48 = vsel %vm238_vm4, %v667_v39, %v237_v45  ;;  %v241_v49 = vsel %vm238_vm4, %v237_v45, %v666_v40  ;;  %v229_v50 = vsel %vm228_vm5, %v662_v41, %v227_v46  ;;  %v231_v51 = vsel %vm228_vm5, %v227_v46, %v661_v42 }
  0xbe   : > { %v563_v52 = vpack.c.bf16 %v241_v49, %v231_v51  ;;  %v576_v53 = vpack.c.bf16 %v239_v48, %v229_v50  ;;  %562 = vmatprep.subr.bf16.mxu0 %v561_v47 }
  0xc0   : > { %v675_v54 = vpop.permute.xlu1 %674  ;;  %v670_v55 = vpop.permute.xlu0 %669  ;;  %564 = vmatpush1.bf16.msra.mxu0 %v563_v52  ;;  %577 = vmatpush3.bf16.msra.mxu1 %v576_v53 }
  0xc1   : > { %v677_v56 = vunpack.i.h.bf16 %v675_v54  ;;  %v676_v57 = vunpack.i.l.bf16 %v675_v54  ;;  %v672_v58 = vunpack.i.h.bf16 %v670_v55  ;;  %v671_v59 = vunpack.i.l.bf16 %v670_v55  ;;  %578 = vmatprep.subr.bf16.mxu1 %v779_v0 }
  0xc3   : > { %v250_v60 = vsel %vm248_vm7, %v671_v59, %v672_v58  ;;  %v260_v61 = vsel %vm258_vm6, %v676_v57, %v677_v56 }
  0xc4   : > { %v257_v62 = vpop.permute.xlu1 %256  ;;  %v247_v63 = vpop.permute.xlu0 %246  ;;  %v565_v1 = vpack.c.bf16 %v260_v61, %v250_v60 }
  0xc5   : > { %v259_v2 = vsel %vm258_vm6, %v677_v56, %v257_v62  ;;  %v261_v3 = vsel %vm258_vm6, %v257_v62, %v676_v57  ;;  %v249_v4 = vsel %vm248_vm7, %v672_v58, %v247_v63  ;;  %v251_v6 = vsel %vm248_vm7, %v247_v63, %v671_v59 }
  0xc6   : > { %v567_v7 = vpack.c.bf16 %v261_v3, %v251_v6  ;;  %v579_v8 = vpack.c.bf16 %v259_v2, %v249_v4  ;;  %566 = vmatprep.subr.bf16.mxu0 %v565_v1 }
  0xc8   : > { %v265_v10 = vpop.permute.xlu1 %264  ;;  %v263_v11 = vpop.permute.xlu0 %262  ;;  %568 = vmatpush1.bf16.msra.mxu0 %v567_v7  ;;  %580 = vmatpush3.bf16.msra.mxu1 %v579_v8 }
  0xc9   : > { %v270_v0 = vsel %vm268_vm8, %v263_v11, %v265_v10  ;;  %548 = vmatprep.subr.mxu1 %v785_v5 }
  0xca   : > { %299 = vmatprep.subr.mxu0 %v270_v0 }
  0xcc   : > { %v267_v12 = vpop.permute.xlu0 %266 }
  0xcd   : > { %v271_v14 = vsel %vm268_vm8, %v267_v12, %v263_v11  ;;  %v269_v15 = vsel %vm268_vm8, %v265_v10, %v267_v12 }
  0xce   : > { %300 = vmatpush1.msra.mxu0 %v271_v14  ;;  %549 = vmatpush3.msra.mxu1 %v269_v15 }
  0xcf   : > { %517 = vmatmul.mubr.msk.f32.vlgmr.msra.gmra.mrb[0].mxu0 %vm279_vm9, %v272_v13  ;;  %551 = vmatmul.mubr.msk.f32.vlgmr.msra.gmra.mrb[0].mxu1 %vm279_vm9, %v272_v13 }
  0xd9   : > { %v277_v9 = vpop.permute.xlu1 %276 }
 0x1a2   : > { %v349_v5 = vpop.f32.mrb[0].mxu0  ;;  %v420_v16 = vpop.f32.mrb[0].mxu1 }
 0x1a3   : > { %v350_v17 = vadd.f32 %v349_v5, %v277_v9  ;;  %v421_v18 = vadd.f32 %v420_v16, %v277_v9  ;;  %v351_v19 = vpop.f32.mrb[1].mxu0  ;;  %v552_v20 = vpop.f32.mrb[1].mxu1 }
 0x1a4   : > { %v352_v21 = vadd.f32 %v351_v19, %v277_v9 }
 0x1a5   : > { %424 = vst [vmem:[%s186_s27] sm:$0xff] %v350_v17  ;;  %426 = vst [vmem:[%s186_s27 + $0x10] sm:$0xff] %v421_v18 }
 0x1a6   : > { %425 = vst [vmem:[%s186_s27 + $0x8] sm:$0xff] %v352_v21 }
 0x1a7   : > { %723 = shalt.err (!%p720_p4)
}
 0x1a8   : > { %s724_s28 = scalar_lea.hbm %s967_s6, 384  ;;  %s728_s11 = scalar_lea.hbm %s1014_s3, 768 }
 0x1a9   : > { %p725_p7 = scmp.ne.s32.totalorder %s967_s6, %s724_s28  ;;  %p729_p0 = scmp.lt.u32.totalorder %s967_s6, %s1014_s3 }
 0x1aa   : > { %p730_p1 = scmp.lt.u32.totalorder %s728_s11, %s724_s28  ;;  %p732_p6 = scmp.lt.u32.totalorder %s724_s28, %s967_s6 }
 0x1ab   : > { %p726_p8 = pnand %p725_p7, %p1022_p11 }
 0x1ac   : > { %p731_p3 = por %p730_p1, %p729_p0 }
 0x1ad   : > { %p727_p9 = pneg %p726_p8 }
 0x1ae   : > { %p733_p12 = por %p732_p6, %p731_p3 }
 0x1b0   : > { %p734_p13 = pnand %p733_p12, %p727_p9 }
 0x1b2   : > { %737 = shalt.err (!%p734_p13)
}
 0x1b3   : > { %587 = dma.vmem_to_hbm [thread:$0]  (%p1022_p11), %s969_s5, 384, %s967_s6, %s428_s16  }
 0x1b4 PF: > { %s454_s20 = sand.u32 1, %s764_s12   ;;  %p1023_p5 = scmp.ne.s32.totalorder %s1018_s24, 0 }
 0x1b5   : > { %p1024_p10 = scmp.ge.s32.totalorder %s776_s15, 2  ;;  %s455_s25 = scalar_lea.sflag [#allocation4], %s454_s20 }
 0x1b7   : > { %p594_p2 = pnand %p1024_p10, %p1023_p5 }
 0x1b9   : > { %759 = dma.done.wait (!%p594_p2), %s455_s25, 384  }
 0x1ba   : > { %761 = vsyncadd (!%p594_p2), %s455_s25, 4294966912  ;;  %p16_p4 = scmp.ge.s32.totalorder %s837_s18, 4   ;;  %s1025_s12 = smov %s768_s13 }
 0x1bb   : > { %s1026_s13 = smov %s772_s14  ;;  %s1027_s14 = smov %s849_s21 }
 0x1bc   : > { %s1028_s15 = smov %s837_s18  ;;  %18 = sbr.rel (!%p16_p4) target bundleno = 5 (0x5), region = 77 }
 0x1c3   :  { %460 = vsyncpa [#allocation3], 1 }
 0x1c4   :  { %462 = vsyncpa [#allocation3 + $0x1], 1 }
 0x1c5   :  { %463 = vsyncpa [#allocation4], 1 }
 0x1c6   :  { %465 = vsyncpa [#allocation4 + $0x1], 1 }

</bundles_post_ra>
